<compile_context>
chip_gen: v7x
topology: tpu7x:2x2x1
jax: 0.10.0
libtpu: 0.0.40
codegen_flags: <defaults>
</compile_context>

<pallas_src>
import functools

import jax
import jax.numpy as jnp
from jax import lax
from jax.experimental import pallas as pl
from jax.experimental.pallas import tpu as pltpu


def _vq_kernel(n_valid, use_bf16_scores,
               x_ref, e_ref, e2h_ref,
               q_ref, ind_ref, osum_ref, esum_ref):
    x = x_ref[...].astype(jnp.float32)            # (TN, D)
    e = e_ref[...]                                # (D, K) f32, VMEM-resident
    tn = x.shape[0]
    k = e.shape[1]

    # Nearest-code search: argmin ||x - e_k||^2 == argmax (x.e_k - 0.5||e_k||^2)
    if use_bf16_scores:
        xe = jnp.dot(x.astype(jnp.bfloat16), e.astype(jnp.bfloat16),
                     preferred_element_type=jnp.float32)          # MXU bf16
    else:
        xe = jnp.dot(x, e, preferred_element_type=jnp.float32)    # MXU f32
    score = xe - e2h_ref[...]                                     # (TN, K)

    max_s = jnp.max(score, axis=1, keepdims=True)                 # (TN, 1)
    iota_k = lax.broadcasted_iota(jnp.int32, (tn, k), 1)          # (TN, K)
    ind = jnp.min(jnp.where(score == max_s, iota_k, k), axis=1)   # first max

    onehot = (iota_k == ind[:, None]).astype(jnp.float32)         # (TN, K)

    # quantize = onehot @ E^T  (exact row selection, == F.embedding)
    q = lax.dot_general(onehot, e, (((1,), (1,)), ((), ())),
                        preferred_element_type=jnp.float32)       # (TN, D)
    q_ref[...] = q.astype(q_ref.dtype)
    ind_ref[...] = ind[None, :]                                   # lane-dense (1, TN)

    # --- EMA statistics, accumulated across the inner ("arbitrary") axis ----
    blk = pl.program_id(0) * pl.num_programs(1) + pl.program_id(1)
    row = blk * tn + lax.broadcasted_iota(jnp.int32, (tn, 1), 0)
    onehot = jnp.where(row < n_valid, onehot, 0.0)  # mask padded rows

    @pl.when(pl.program_id(1) == 0)
    def _():
        osum_ref[...] = jnp.zeros_like(osum_ref)
        esum_ref[...] = jnp.zeros_like(esum_ref)

    osum_ref[...] += jnp.sum(onehot, axis=0, keepdims=True)       # (1, K)
    esum = lax.dot_general(x, onehot, (((0,), (0,)), ((), ())),
                           preferred_element_type=jnp.float32)    # (D, K)
    esum_ref[...] += esum[None, :, :]


def vq_forward(inputs, embed, commitment_cost=1.0, block_rows=None,
               use_bf16_scores=True, vmem_limit_bytes=None):
    """inputs: (..., D); embed: (D, K) codebook (the module's `embed` buffer).

    Returns (quantize_st, embed_ind, loss, onehot_sum, embed_sum).  The last
    two feed the training-mode EMA buffer update (see ema_update)."""
    orig_shape = inputs.shape
    D, K = embed.shape
    flat = inputs.reshape(-1, D)
    N = flat.shape[0]

    # Row-tile size: keep the (TN, K) score/one-hot intermediates ~2 MiB each
    # so the pipeline fits default scoped VMEM on every generation
    # (v5e 16 MiB default / v6e 32 MiB / v7x 64 MiB physical).  Tune
    # block_rows (+ vmem_limit_bytes) per chip for peak throughput.
    if block_rows is None:
        block_rows = max(256, min(4096, (512 * 1024) // max(K, 1)))
    TN = min(block_rows, pl.cdiv(N, 128) * 128)
    TN = max(128, (TN // 128) * 128)          # multiple of 128 for lane-dense ind
    num_blocks = pl.cdiv(N, TN)

    # Outer "parallel" axis (2 super-blocks feeds both v7x TensorCores, and is
    # a no-op serial split on v5e/v6e); inner "arbitrary" axis carries the
    # VMEM-resident EMA-statistic accumulators.
    P = min(2, num_blocks)
    J = pl.cdiv(num_blocks, P)
    total_blocks = P * J
    N_pad = total_blocks * TN

    embed_f32 = embed.astype(jnp.float32)
    flat_p = flat if N_pad == N else jnp.pad(flat, ((0, N_pad - N), (0, 0)))

    # Hoisted once per call: 0.5*||e_k||^2 (the ||x||^2 term is dropped).
    e2_half = 0.5 * jnp.sum(embed_f32 * embed_f32, axis=0, keepdims=True)  # (1, K)

    kernel = functools.partial(_vq_kernel, N, use_bf16_scores)

    out_shapes = (
        jax.ShapeDtypeStruct((N_pad, D), inputs.dtype),          # quantize (padded)
        jax.ShapeDtypeStruct((total_blocks, TN), jnp.int32),     # indices, lane-dense
        jax.ShapeDtypeStruct((P, K), jnp.float32),               # onehot_sum partials
        jax.ShapeDtypeStruct((P, D, K), jnp.float32),            # embed_sum partials
    )

    grid_spec = pltpu.PrefetchScalarGridSpec(
        num_scalar_prefetch=0,
        grid=(P, J),
        in_specs=[
            pl.BlockSpec((TN, D), lambda p, j: (p * J + j, 0)),  # x row-tile
            pl.BlockSpec((D, K), lambda p, j: (0, 0)),           # codebook (resident)
            pl.BlockSpec((1, K), lambda p, j: (0, 0)),           # 0.5*||e||^2 (resident)
        ],
        out_specs=[
            pl.BlockSpec((TN, D), lambda p, j: (p * J + j, 0)),
            pl.BlockSpec((1, TN), lambda p, j: (p * J + j, 0)),
            pl.BlockSpec((1, K), lambda p, j: (p, 0)),           # accumulated over j
            pl.BlockSpec((1, D, K), lambda p, j: (p, 0, 0)),     # accumulated over j
        ],
    )

    cparams = dict(dimension_semantics=("parallel", "arbitrary"))
    if vmem_limit_bytes is not None:
        cparams["vmem_limit_bytes"] = vmem_limit_bytes

    q_pad, ind_blocks, osum_part, esum_part = pl.pallas_call(
        kernel,
        out_shape=out_shapes,
        grid_spec=grid_spec,
        compiler_params=pltpu.CompilerParams(**cparams),
    )(flat_p, embed_f32, e2_half)

    quantize = q_pad[:N].reshape(orig_shape)
    embed_ind = ind_blocks.reshape(-1)[:N].reshape(orig_shape[:-1])
    onehot_sum = jnp.sum(osum_part, axis=0)   # (K,)
    embed_sum = jnp.sum(esum_part, axis=0)    # (D, K)

    # Commitment loss + straight-through estimator in plain JAX so gradients
    # flow to `inputs` exactly as in the PyTorch module.
    q_sg = lax.stop_gradient(quantize.astype(jnp.float32))
    loss = commitment_cost * jnp.mean((q_sg - inputs.astype(jnp.float32)) ** 2)
    quantize_st = inputs + lax.stop_gradient(quantize - inputs)
    return quantize_st, embed_ind, loss, onehot_sum, embed_sum


def ema_update(embed, cluster_size, embed_avg, onehot_sum, embed_sum,
               decay=0.99, eps=1e-5):
    """Functional equivalent of the in-place EMA buffer update (world_size=1)."""
    # TODO(synk): multi-device all_reduce of onehot_sum/embed_sum (world_size>1)
    n_embed = embed.shape[1]
    cluster_size = cluster_size * decay + onehot_sum * (1.0 - decay)
    embed_avg = embed_avg * decay + embed_sum * (1.0 - decay)
    n = jnp.sum(cluster_size)
    cs = (cluster_size + eps) / (n + n_embed * eps) * n
    embed_new = embed_avg / cs[None, :]
    return embed_new, cluster_size, embed_avg


def _reference(flat, embed):
    """Pure-JAX reference using the same bf16 nearest-code scoring."""
    score = (jnp.dot(flat.astype(jnp.bfloat16), embed.astype(jnp.bfloat16),
                     preferred_element_type=jnp.float32)
             - 0.5 * jnp.sum(embed * embed, axis=0, keepdims=True))
    ind = jnp.argmax(score, axis=1).astype(jnp.int32)
    q = embed.T[ind]
    onehot = jax.nn.one_hot(ind, embed.shape[1], dtype=jnp.float32)
    return ind, q, onehot


if __name__ == "__main__":
    key = jax.random.PRNGKey(0)
    k_x, k_e, k_x2 = jax.random.split(key, 3)

    B, H, W = 2, 8, 8
    dim, n_embed = 32, 128

    # module buffers
    embed = jax.random.normal(k_e, (dim, n_embed), dtype=jnp.float32)
    cluster_size = jnp.zeros((n_embed,), jnp.float32)
    embed_avg = embed

    # channels-last inputs (..., dim)
    x = jax.random.normal(k_x, (B, H, W, dim), dtype=jnp.float32)

    quantize, embed_ind, loss, onehot_sum, embed_sum = vq_forward(
        x, embed, commitment_cost=1.0)
    jax.block_until_ready((quantize, embed_ind, loss, onehot_sum, embed_sum))

    # training-mode EMA buffer update (plain-JAX glue; world_size == 1)
    embed_new, cluster_size, embed_avg = ema_update(
        embed, cluster_size, embed_avg, onehot_sum, embed_sum)
    jax.block_until_ready((embed_new, cluster_size, embed_avg))

    # ---- sanity checks vs a pure-JAX reference (single block) --------------
    flat = x.reshape(-1, dim)
    ind_ref, q_ref, onehot_ref = _reference(flat, embed)

    assert jnp.array_equal(embed_ind.reshape(-1), ind_ref)
    assert jnp.allclose(quantize.reshape(-1, dim), q_ref, atol=1e-5)
    assert jnp.allclose(loss, jnp.mean((q_ref.reshape(x.shape) - x) ** 2),
                        atol=1e-5, rtol=1e-5)
    assert jnp.array_equal(onehot_sum, jnp.sum(onehot_ref, axis=0))
    assert jnp.allclose(embed_sum, flat.T @ onehot_ref, atol=1e-2, rtol=1e-3)

    # chosen codes are the true (f32) nearest neighbours up to bf16 score error
    dist_f32 = (jnp.sum(flat * flat, 1, keepdims=True) - 2.0 * flat @ embed
                + jnp.sum(embed * embed, 0, keepdims=True))
    chosen = jnp.take_along_axis(dist_f32, embed_ind.reshape(-1, 1), axis=1)[:, 0]
    assert bool(jnp.all(chosen <= jnp.min(dist_f32, axis=1) + 0.5))

    # ---- multi-block path: exercises padding mask + accumulators -----------
    B2, H2, W2 = 2, 16, 18                       # N = 576 (4.5 blocks of 128)
    x2 = jax.random.normal(k_x2, (B2, H2, W2, dim), dtype=jnp.float32)
    q2, ind2, loss2, osum2, esum2 = vq_forward(
        x2, embed, commitment_cost=1.0, block_rows=128)
    jax.block_until_ready((q2, ind2, loss2, osum2, esum2))

    flat2 = x2.reshape(-1, dim)
    ind2_ref, q2_ref, onehot2_ref = _reference(flat2, embed)
    assert jnp.array_equal(ind2.reshape(-1), ind2_ref)
    assert jnp.allclose(q2.reshape(-1, dim), q2_ref, atol=1e-5)
    assert jnp.array_equal(osum2, jnp.sum(onehot2_ref, axis=0))
    assert float(jnp.sum(osum2)) == flat2.shape[0]          # padded rows masked
    assert jnp.allclose(esum2, flat2.T @ onehot2_ref, atol=1e-2, rtol=1e-3)
    assert jnp.allclose(loss2, jnp.mean((q2_ref.reshape(x2.shape) - x2) ** 2),
                        atol=1e-5, rtol=1e-5)

    print("KERNEL_OK")
</pallas_src>

<mosaic_0001>
module attributes {stable_mosaic.version = 11 : i64} {
  func.func @_vq_kernel(%arg0: i32, %arg1: i32, %arg2: memref<128x32xf32, #tpu.memory_space<vmem>>, %arg3: memref<32x128xf32, #tpu.memory_space<vmem>>, %arg4: memref<1x128xf32, #tpu.memory_space<vmem>>, %arg5: memref<128x32xf32, #tpu.memory_space<vmem>>, %arg6: memref<1x128xi32, #tpu.memory_space<vmem>>, %arg7: memref<1x128xf32, #tpu.memory_space<vmem>>, %arg8: memref<1x32x128xf32, #tpu.memory_space<vmem>>) attributes {dimension_semantics = [#tpu.dimension_semantics<parallel>, #tpu.dimension_semantics<arbitrary>], iteration_bounds = array<i64: 1, 1>, scalar_prefetch = 0 : i64, scratch_operands = 0 : i64, tpu.core_type = #tpu.core_type<tc>, window_params = [{transform_indices = @transform_0, window_bounds = array<i64: 128, 32>}, {pipeline_mode = #tpu.pipeline_mode<synchronous>, transform_indices = @transform_1, window_bounds = array<i64: 32, 128>}, {pipeline_mode = #tpu.pipeline_mode<synchronous>, transform_indices = @transform_2, window_bounds = array<i64: 1, 128>}, {transform_indices = @transform_3, window_bounds = array<i64: 128, 32>}, {transform_indices = @transform_4, window_bounds = array<i64: 1, 128>}, {transform_indices = @transform_5, window_bounds = array<i64: 1, 128>}, {transform_indices = @transform_6, window_bounds = array<i64: 1, 32, 128>}]} {
    %c0 = arith.constant 0 : index
    %c0_0 = arith.constant 0 : index
    %0 = vector.load %arg2[%c0, %c0_0] : memref<128x32xf32, #tpu.memory_space<vmem>>, vector<128x32xf32>
    %c0_1 = arith.constant 0 : index
    %c0_2 = arith.constant 0 : index
    %1 = vector.load %arg3[%c0_1, %c0_2] : memref<32x128xf32, #tpu.memory_space<vmem>>, vector<32x128xf32>
    %2 = arith.truncf %0 : vector<128x32xf32> to vector<128x32xbf16>
    %3 = arith.truncf %1 : vector<32x128xf32> to vector<32x128xbf16>
    %cst = arith.constant dense<0.000000e+00> : vector<128x128xf32>
    %4 = tpu.matmul %2, %3, %cst {dimension_numbers = #tpu.dot_dimension_numbers<[1], [0], [0], [1], [0, 0, 1, 1], [], []>} : vector<128x32xbf16>, vector<32x128xbf16>, vector<128x128xf32> -> vector<128x128xf32>
    %c0_3 = arith.constant 0 : index
    %c0_4 = arith.constant 0 : index
    %5 = vector.load %arg4[%c0_3, %c0_4] : memref<1x128xf32, #tpu.memory_space<vmem>>, vector<1x128xf32>
    %6 = vector.broadcast %5 : vector<1x128xf32> to vector<128x128xf32>
    %7 = arith.subf %4, %6 : vector<128x128xf32>
    %cst_5 = arith.constant dense<0xFF800000> : vector<128xf32>
    %8 = vector.multi_reduction <maximumf>, %7, %cst_5 [1] : vector<128x128xf32> to vector<128xf32>
    %9 = vector.shape_cast %8 : vector<128xf32> to vector<128x1xf32>
    %10 = tpu.iota {dimensions = array<i32: 1>} : vector<128x128xi32>
    %11 = vector.broadcast %9 : vector<128x1xf32> to vector<128x128xf32>
    %12 = arith.cmpf oeq, %7, %11 : vector<128x128xf32>
    %c128_i32 = arith.constant 128 : i32
    %13 = vector.broadcast %c128_i32 : i32 to vector<128x128xi32>
    %14 = arith.select %12, %10, %13 : vector<128x128xi1>, vector<128x128xi32>
    %cst_6 = arith.constant dense<2147483647> : vector<128xi32>
    %15 = vector.multi_reduction <minsi>, %14, %cst_6 [1] : vector<128x128xi32> to vector<128xi32>
    %16 = vector.shape_cast %15 : vector<128xi32> to vector<128x1xi32>
    %17 = vector.broadcast %16 : vector<128x1xi32> to vector<128x128xi32>
    %18 = arith.cmpi eq, %10, %17 : vector<128x128xi32>
    %19 = arith.extui %18 : vector<128x128xi1> to vector<128x128xi32>
    %20 = arith.sitofp %19 : vector<128x128xi32> to vector<128x128xf32>
    %cst_7 = arith.constant dense<0.000000e+00> : vector<128x32xf32>
    %21 = tpu.matmul %20, %1, %cst_7 {dimension_numbers = #tpu.dot_dimension_numbers<[1], [1], [0], [0], [0, 0, 1, 0], [], []>} : vector<128x128xf32>, vector<32x128xf32>, vector<128x32xf32> -> vector<128x32xf32>
    %c0_8 = arith.constant 0 : index
    %c0_9 = arith.constant 0 : index
    %22 = vector.load %arg5[%c0_8, %c0_9] : memref<128x32xf32, #tpu.memory_space<vmem>>, vector<128x32xf32>
    tpu.vector_store %arg5[%c0_8, %c0_9], %21 {strides = array<i32>} : memref<128x32xf32, #tpu.memory_space<vmem>>, vector<128x32xf32>,
    %23 = vector.shape_cast %15 : vector<128xi32> to vector<1x128xi32>
    %c0_10 = arith.constant 0 : index
    %c0_11 = arith.constant 0 : index
    %24 = vector.load %arg6[%c0_10, %c0_11] : memref<1x128xi32, #tpu.memory_space<vmem>>, vector<1x128xi32>
    tpu.vector_store %arg6[%c0_10, %c0_11], %23 {strides = array<i32>} : memref<1x128xi32, #tpu.memory_space<vmem>>, vector<1x128xi32>,
    %c1_i32 = arith.constant 1 : i32
    %25 = arith.muli %arg0, %c1_i32 : i32
    %26 = arith.addi %25, %arg1 : i32
    %c128_i32_12 = arith.constant 128 : i32
    %27 = arith.muli %26, %c128_i32_12 : i32
    %28 = tpu.iota {dimensions = array<i32: 0>} : vector<128x1xi32>
    %29 = vector.broadcast %27 : i32 to vector<128x1xi32>
    %30 = arith.addi %29, %28 : vector<128x1xi32>
    %c128_i32_13 = arith.constant 128 : i32
    %31 = vector.broadcast %c128_i32_13 : i32 to vector<128x1xi32>
    %32 = arith.cmpi slt, %30, %31 : vector<128x1xi32>
    %cst_14 = arith.constant 0.000000e+00 : f32
    %33 = vector.shape_cast %32 : vector<128x1xi1> to vector<128x1xi1>
    %34 = vector.broadcast %33 : vector<128x1xi1> to vector<128x128xi1>
    %35 = vector.broadcast %cst_14 : f32 to vector<128x128xf32>
    %36 = arith.select %34, %20, %35 : vector<128x128xi1>, vector<128x128xf32>
    %c0_i32 = arith.constant 0 : i32
    %37 = arith.cmpi eq, %arg1, %c0_i32 : i32
    %38 = arith.extui %37 : i1 to i32
    %c0_i32_15 = arith.constant 0 : i32
    %39 = arith.cmpi ne, %38, %c0_i32_15 : i32
    scf.if %39 {
      %cst_28 = arith.constant 0.000000e+00 : f32
      %50 = vector.broadcast %cst_28 : f32 to vector<1x128xf32>
      %c0_29 = arith.constant 0 : index
      %c0_30 = arith.constant 0 : index
      %51 = vector.load %arg7[%c0_29, %c0_30] : memref<1x128xf32, #tpu.memory_space<vmem>>, vector<1x128xf32>
      tpu.vector_store %arg7[%c0_29, %c0_30], %50 {strides = array<i32>} : memref<1x128xf32, #tpu.memory_space<vmem>>, vector<1x128xf32>,
      %cst_31 = arith.constant 0.000000e+00 : f32
      %52 = vector.broadcast %cst_31 : f32 to vector<1x32x128xf32>
      %c0_32 = arith.constant 0 : index
      %c0_33 = arith.constant 0 : index
      %c0_34 = arith.constant 0 : index
      %53 = vector.load %arg8[%c0_32, %c0_33, %c0_34] : memref<1x32x128xf32, #tpu.memory_space<vmem>>, vector<1x32x128xf32>
      tpu.vector_store %arg8[%c0_32, %c0_33, %c0_34], %52 {strides = array<i32>} : memref<1x32x128xf32, #tpu.memory_space<vmem>>, vector<1x32x128xf32>,
    } else {
    }
    %c0_16 = arith.constant 0 : index
    %c0_17 = arith.constant 0 : index
    %40 = vector.load %arg7[%c0_16, %c0_17] : memref<1x128xf32, #tpu.memory_space<vmem>>, vector<1x128xf32>
    %cst_18 = arith.constant dense<0.000000e+00> : vector<128xf32>
    %41 = vector.multi_reduction <add>, %36, %cst_18 [0] : vector<128x128xf32> to vector<128xf32>
    %42 = vector.shape_cast %41 : vector<128xf32> to vector<1x128xf32>
    %43 = arith.addf %40, %42 : vector<1x128xf32>
    %c0_19 = arith.constant 0 : index
    %c0_20 = arith.constant 0 : index
    %44 = vector.load %arg7[%c0_19, %c0_20] : memref<1x128xf32, #tpu.memory_space<vmem>>, vector<1x128xf32>
    tpu.vector_store %arg7[%c0_19, %c0_20], %43 {strides = array<i32>} : memref<1x128xf32, #tpu.memory_space<vmem>>, vector<1x128xf32>,
    %cst_21 = arith.constant dense<0.000000e+00> : vector<32x128xf32>
    %45 = tpu.matmul %0, %36, %cst_21 {dimension_numbers = #tpu.dot_dimension_numbers<[0], [0], [1], [1], [0, 1, 1, 1], [], []>} : vector<128x32xf32>, vector<128x128xf32>, vector<32x128xf32> -> vector<32x128xf32>
    %c0_22 = arith.constant 0 : index
    %c0_23 = arith.constant 0 : index
    %c0_24 = arith.constant 0 : index
    %46 = vector.load %arg8[%c0_22, %c0_23, %c0_24] : memref<1x32x128xf32, #tpu.memory_space<vmem>>, vector<1x32x128xf32>
    %47 = vector.shape_cast %45 : vector<32x128xf32> to vector<1x32x128xf32>
    %48 = arith.addf %46, %47 : vector<1x32x128xf32>
    %c0_25 = arith.constant 0 : index
    %c0_26 = arith.constant 0 : index
    %c0_27 = arith.constant 0 : index
    %49 = vector.load %arg8[%c0_25, %c0_26, %c0_27] : memref<1x32x128xf32, #tpu.memory_space<vmem>>, vector<1x32x128xf32>
    tpu.vector_store %arg8[%c0_25, %c0_26, %c0_27], %48 {strides = array<i32>} : memref<1x32x128xf32, #tpu.memory_space<vmem>>, vector<1x32x128xf32>,
    return
  }
  func.func @transform_0(%arg0: i32, %arg1: i32) -> (i32, i32) {
    %c1_i32 = arith.constant 1 : i32
    %0 = arith.muli %arg0, %c1_i32 : i32
    %1 = arith.addi %0, %arg1 : i32
    %c0_i32 = arith.constant 0 : i32
    %c0_i32_0 = arith.constant 0 : i32
    return %1, %c0_i32 : i32, i32
  }
  func.func @transform_1(%arg0: i32, %arg1: i32) -> (i32, i32) {
    %c0_i32 = arith.constant 0 : i32
    %c0_i32_0 = arith.constant 0 : i32
    %c0_i32_1 = arith.constant 0 : i32
    return %c0_i32, %c0_i32_0 : i32, i32
  }
  func.func @transform_2(%arg0: i32, %arg1: i32) -> (i32, i32) {
    %c0_i32 = arith.constant 0 : i32
    %c0_i32_0 = arith.constant 0 : i32
    %c0_i32_1 = arith.constant 0 : i32
    return %c0_i32, %c0_i32_0 : i32, i32
  }
  func.func @transform_3(%arg0: i32, %arg1: i32) -> (i32, i32) {
    %c1_i32 = arith.constant 1 : i32
    %0 = arith.muli %arg0, %c1_i32 : i32
    %1 = arith.addi %0, %arg1 : i32
    %c0_i32 = arith.constant 0 : i32
    %c0_i32_0 = arith.constant 0 : i32
    return %1, %c0_i32 : i32, i32
  }
  func.func @transform_4(%arg0: i32, %arg1: i32) -> (i32, i32) {
    %c1_i32 = arith.constant 1 : i32
    %0 = arith.muli %arg0, %c1_i32 : i32
    %1 = arith.addi %0, %arg1 : i32
    %c0_i32 = arith.constant 0 : i32
    %c0_i32_0 = arith.constant 0 : i32
    return %1, %c0_i32 : i32, i32
  }
  func.func @transform_5(%arg0: i32, %arg1: i32) -> (i32, i32) {
    %c0_i32 = arith.constant 0 : i32
    %c0_i32_0 = arith.constant 0 : i32
    return %arg0, %c0_i32 : i32, i32
  }
  func.func @transform_6(%arg0: i32, %arg1: i32) -> (i32, i32, i32) {
    %c0_i32 = arith.constant 0 : i32
    %c0_i32_0 = arith.constant 0 : i32
    %c0_i32_1 = arith.constant 0 : i32
    return %arg0, %c0_i32, %c0_i32_0 : i32, i32, i32
  }
}

</mosaic_0001>

<bundles_post_ra>
// kernel: tpu_custom_call.1
= control target key start
LH: loop header
LB: loop body
LE: loop exit
PB: predicated region body
PF: predicated region fallthrough
CT: control target
= control target key end

     0   :  { %12 = vsyncpa [#allocation3], 0  ;;  %vm88_vm0 = vcmask 261120   ;;  %s2299_s0 = inlined_call_operand.vmem [shape: f32[128,32], index: 0, kind: input, shape index: {}]   ;;  %s2300_s1 = inlined_call_operand.vmem [shape: f32[32,128], index: 1, kind: input, shape index: {}]   ;;  %s2301_s2 = inlined_call_operand.vmem [shape: f32[1,128], index: 2, kind: input, shape index: {}]   ;;  %s2302_s3 = inlined_call_operand.vmem [shape: f32[128,32], index: 3, kind: output, shape index: {0}]   ;;  %s2303_s4 = inlined_call_operand.hbm [shape: s32[1,128], index: 4, kind: output, shape index: {1}]   ;;  %s2304_s5 = inlined_call_operand.hbm [shape: f32[1,128], index: 5, kind: output, shape index: {2}]   ;;  %s2305_s6 = inlined_call_operand.hbm [shape: f32[1,32,128], index: 6, kind: output, shape index: {3}]  }
   0x1   :  { %v74_v0 = vld [vmem:[%s2300_s1] sm:$0xff]  ;;  %v75_v1 = vld [vmem:[%s2300_s1 + $0x8] sm:$0xff]  ;;  %v76_v2 = vld [vmem:[%s2300_s1 + $0x10] sm:$0xff] }
   0x2   :  { %v86_v3 = vpack.c.bf16 %v75_v1, %v74_v0  ;;  %v77_v4 = vld [vmem:[%s2300_s1 + $0x18] sm:$0xff]  ;;  %v1555_v5 = vld [vmem:[%s2299_s0] sm:$0xff]  ;;  %v1560_v6 = vld [vmem:[%s2299_s0 + $0x8] sm:$0xff] }
   0x3   :  { %v87_v7 = vpack.c.bf16 %v77_v4, %v76_v2  ;;  %v78_v8 = vpack.c.bf16 %v1560_v6, %v1555_v5  ;;  %v1568_v9 = vld [vmem:[%s2299_s0 + $0x10] sm:$0xff]  ;;  %v1573_v10 = vld [vmem:[%s2299_s0 + $0x18] sm:$0xff]  ;;  %v1578_v11 = vld [vmem:[%s2299_s0 + $0x20] sm:$0xff] }
   0x4   :  { %1289 = vmatprep.subr.bf16.mxu0 %v86_v3  ;;  %1380 = vmatprep.subr.bf16.mxu1 %v86_v3  ;;  %v1583_v12 = vld [vmem:[%s2299_s0 + $0x28] sm:$0xff] }
   0x5   :  { %1290 = vmatpush3.bf16.msra.mxu0 %v86_v3  ;;  %1293 = vmatprep.mubr.msk.bf16.mxu0 %vm88_vm0, %v78_v8 }
   0x6   :  { %1291 = vmatprep.subr.bf16.mxu0 %v87_v7  ;;  %1382 = vmatpush3.bf16.xpose.msra.mxu1 %v86_v3 }
   0x7   :  { %1384 = vmatprep.subr.bf16.mxu1 %v87_v7 }
   0x8   :  { %13 = vsyncpa [#allocation5], 0  ;;  %v79_v13 = vpack.c.bf16 %v1573_v10, %v1568_v9  ;;  %v80_v14 = vpack.c.bf16 %v1583_v12, %v1578_v11  ;;  %v1594_v15 = vld [vmem:[%s2299_s0 + $0x30] sm:$0xff]  ;;  %v1599_v16 = vld [vmem:[%s2299_s0 + $0x38] sm:$0xff]  ;;  %v265_v63 = vlaneseq  ;;  %s1501_s13 = smov [#allocation2]  }
   0x9   :  { %1292 = vmatpush3.bf16.msra.mxu0 %v87_v7  ;;  %v1604_v17 = vld [vmem:[%s2299_s0 + $0x40] sm:$0xff]  ;;  %v1609_v18 = vld [vmem:[%s2299_s0 + $0x48] sm:$0xff]  ;;  %v81_v19 = vpack.c.bf16 %v1599_v16, %v1594_v15  ;;  %v1620_v21 = vld [vmem:[%s2299_s0 + $0x50] sm:$0xff]  ;;  %s1123_s14 = sshll.u32 %s1501_s13, 4  ;;  %s1124_s14 = int_to_ptr.vmem [resolvable:$true] %s1123_s14 }
   0xa   :  { %v82_v20 = vpack.c.bf16 %v1609_v18, %v1604_v17  ;;  %v1625_v22 = vld [vmem:[%s2299_s0 + $0x58] sm:$0xff]  ;;  %v1630_v23 = vld [vmem:[%s2299_s0 + $0x60] sm:$0xff]  ;;  %v1635_v24 = vld [vmem:[%s2299_s0 + $0x68] sm:$0xff]  ;;  %v1693_v0 = vand.u32 127, %v265_v63 }
   0xb   :  { %v83_v25 = vpack.c.bf16 %v1625_v22, %v1620_v21  ;;  %v84_v26 = vpack.c.bf16 %v1635_v24, %v1630_v23  ;;  %v1646_v27 = vld [vmem:[%s2299_s0 + $0x70] sm:$0xff]  ;;  %v1651_v28 = vld [vmem:[%s2299_s0 + $0x78] sm:$0xff]  ;;  %v1190_v30 = vld [vmem:[%s2301_s2] ss:$0 sm:$0xff]  ;;  %s1500_s0 = smov [#allocation4]  }
   0xc   :  { %1294 = vmatmul.mubr.msk.bf16.vlgmr.msra.gmra.mrb[0].mxu0 %vm88_vm0, %v79_v13  ;;  %v85_v29 = vpack.c.bf16 %v1651_v28, %v1646_v27  ;;  %s1133_s2 = sshll.u32 %s1500_s0, 4  ;;  %s1134_s2 = int_to_ptr.vmem [resolvable:$true] %s1133_s2 }
   0xd   :  { %1297 = vmatprep.mubr.msk.bf16.mxu0 %vm88_vm0, %v80_v14  ;;  %s1427_s15 = scalar_lea.vmem %s1134_s2, 16  ;;  %s1431_s16 = scalar_lea.vmem %s1134_s2, 32 }
   0xe   :  { %1386 = vmatpush3.bf16.xpose.msra.mxu1 %v87_v7  ;;  %p1428_p0 = scmp.ne.s32.totalorder %s1134_s2, %s1427_s15  ;;  %p1432_p1 = scmp.lt.s32.totalorder %s1134_s2, %s1134_s2 }
   0xf   :  { %p1433_p2 = scmp.lt.s32.totalorder %s1431_s16, %s1427_s15 }
  0x11   :  { %p1434_p3 = por %p1433_p2, %p1432_p1 }
  0x13   :  { %p1435_p4 = pnand %p1434_p3, %p1428_p0 }
  0x14   :  { %1298 = vmatmul.mubr.msk.bf16.gmra.mrb[4].mxu0 %vm88_vm0, %v81_v19 }
  0x15   :  { %1301 = vmatprep.mubr.msk.bf16.mxu0 %vm88_vm0, %v82_v20 }
  0x1c   :  { %1302 = vmatmul.mubr.msk.bf16.gmra.mrb[8].mxu0 %vm88_vm0, %v83_v25 }
  0x1d   :  { %1305 = vmatprep.mubr.msk.bf16.mxu0 %vm88_vm0, %v84_v26 }
  0x24   :  { %1306 = vmatmul.mubr.msk.bf16.gmra.mrb[12].mxu0 %vm88_vm0, %v85_v29 }
  0xdf   :  { %v1295_v31 = vpop.f32.mrb[0].mxu0 }
  0xe0   :  { %v219_v32 = vsub.f32 %v1295_v31, %v1190_v30  ;;  %v147_v33 = vpop.f32.mrb[1].mxu0 }
  0xe1   :  { %v217_v34 = vsub.f32 %v147_v33, %v1190_v30  ;;  %v1296_v35 = vpop.f32.mrb[2].mxu0 }
  0xe2   :  { %237 = vmax.xlane.f32.xlu1 %v219_v32  ;;  %v150_v36 = vpop.f32.mrb[3].mxu0  ;;  %v220_v37 = vsub.f32 %v1296_v35, %v1190_v30 }
  0xe3   :  { %233 = vmax.xlane.f32.xlu0 %v217_v34  ;;  %v218_v38 = vsub.f32 %v150_v36, %v1190_v30 }
  0xe6   :  { %239 = vmax.xlane.f32.xlu1 %v220_v37 }
  0xe7   :  { %235 = vmax.xlane.f32.xlu0 %v218_v38  ;;  %v1299_v39 = vpop.f32.mrb[4].mxu0 }
  0xe8   :  { %v163_v40 = vpop.f32.mrb[5].mxu0  ;;  %v1662_v45 = vsub.f32 %v1299_v39, %v1190_v30 }
  0xe9   :  { %v1659_v41 = vsub.f32 %v163_v40, %v1190_v30  ;;  %v1300_v42 = vpop.f32.mrb[6].mxu0 }
  0xea   :  { %v166_v43 = vpop.f32.mrb[7].mxu0  ;;  %v1664_v46 = vsub.f32 %v1300_v42, %v1190_v30 }
  0xeb   :  { %v222_v44 = vsub.f32 %v166_v43, %v1190_v30  ;;  %241 = vmax.xlane.f32.xlu0 %v1659_v41 }
  0xed   :  { %243 = vmax.xlane.f32.xlu1 %v222_v44 }
  0xef   :  { %245 = vmax.xlane.f32.xlu0 %v1662_v45  ;;  %v1303_v47 = vpop.f32.mrb[8].mxu0 }
  0xf0   :  { %v179_v48 = vpop.f32.mrb[9].mxu0  ;;  %v1673_v53 = vsub.f32 %v1303_v47, %v1190_v30 }
  0xf1   :  { %v1667_v49 = vsub.f32 %v179_v48, %v1190_v30  ;;  %247 = vmax.xlane.f32.xlu1 %v1664_v46  ;;  %v1304_v50 = vpop.f32.mrb[10].mxu0 }
  0xf2   :  { %v182_v51 = vpop.f32.mrb[11].mxu0  ;;  %v1676_v54 = vsub.f32 %v1304_v50, %v1190_v30 }
  0xf3   :  { %v1670_v52 = vsub.f32 %v182_v51, %v1190_v30  ;;  %249 = vmax.xlane.f32.xlu0 %v1667_v49 }
  0xf5   :  { %251 = vmax.xlane.f32.xlu1 %v1670_v52 }
  0xf7   :  { %253 = vmax.xlane.f32.xlu0 %v1673_v53  ;;  %v1307_v55 = vpop.f32.mrb[12].mxu0 }
  0xf8   :  { %v195_v56 = vpop.f32.mrb[13].mxu0  ;;  %v1685_v61 = vsub.f32 %v1307_v55, %v1190_v30 }
  0xf9   :  { %v1679_v57 = vsub.f32 %v195_v56, %v1190_v30  ;;  %255 = vmax.xlane.f32.xlu1 %v1676_v54  ;;  %v1308_v58 = vpop.f32.mrb[14].mxu0 }
  0xfa   :  { %v198_v59 = vpop.f32.mrb[15].mxu0  ;;  %v1688_v62 = vsub.f32 %v1308_v58, %v1190_v30 }
  0xfb   :  { %v1682_v60 = vsub.f32 %v198_v59, %v1190_v30  ;;  %257 = vmax.xlane.f32.xlu0 %v1679_v57 }
  0xfd   :  { %259 = vmax.xlane.f32.xlu1 %v1682_v60 }
  0xff   :  { %261 = vmax.xlane.f32.xlu0 %v1685_v61 }
 0x101   :  { %263 = vmax.xlane.f32.xlu1 %v1688_v62 }
 0x16f   :  { %v238_v1 = vpop.xlane.xlu1 %237 }
 0x170   :  { %vm269_vm1 = vcmp.eq.f32.partialorder %v219_v32, %v238_v1  ;;  %v234_v2 = vpop.xlane.xlu0 %233 }
 0x171   :  { %v1696_v3 = vsel %vm269_vm1, %v1693_v0, 128  ;;  %vm267_vm2 = vcmp.eq.f32.partialorder %v217_v34, %v234_v2 }
 0x172   :  { %v1699_v4 = vsel %vm267_vm2, %v1693_v0, 128  ;;  %v328_v7 = vshra.s32 %v1696_v3, 16 }
 0x173   :  { %v240_v8 = vpop.xlane.xlu1 %239  ;;  %v300_v19 = vshra.s32 %v1699_v4, 16 }
 0x174   :  { %vm270_vm3 = vcmp.eq.f32.partialorder %v220_v37, %v240_v8  ;;  %v236_v13 = vpop.xlane.xlu0 %235  ;;  %v1702_v14 = vcvt.s32.f32 %v328_v7 }
 0x175   :  { %vm268_vm4 = vcmp.eq.f32.partialorder %v218_v38, %v236_v13  ;;  %v1706_v20 = vsel %vm270_vm3, %v1693_v0, 128  ;;  %v1713_v30 = vcvt.s32.f32 %v300_v19 }
 0x176   :  { %v1709_v25 = vsel %vm268_vm4, %v1693_v0, 128  ;;  %331 = vmin.xlane.f32.xlu0 %v1702_v14  ;;  %v342_v32 = vshra.s32 %v1706_v20, 16 }
 0x177   :  { %v314_v26 = vshra.s32 %v1709_v25, 16 }
 0x178   :  { %v242_v29 = vpop.xlane.xlu0 %241  ;;  %v1725_v36 = vcvt.s32.f32 %v342_v32 }
 0x179   :  { %v1715_v31 = vcvt.s32.f32 %v314_v26  ;;  %vm271_vm5 = vcmp.eq.f32.partialorder %v1659_v41, %v242_v29 }
 0x17a   :  { %v244_v33 = vpop.xlane.xlu1 %243  ;;  %303 = vmin.xlane.f32.xlu0 %v1713_v30  ;;  %v1729_v38 = vsel %vm271_vm5, %v1693_v0, 128 }
 0x17b   :  { %vm272_vm6 = vcmp.eq.f32.partialorder %v222_v44, %v244_v33  ;;  %317 = vmin.xlane.f32.xlu1 %v1715_v31  ;;  %v356_v47 = vshra.s32 %v1729_v38, 16 }
 0x17c   :  { %v1722_v34 = vsel %vm272_vm6, %v1693_v0, 128  ;;  %v246_v35 = vpop.xlane.xlu0 %245 }
 0x17d   :  { %vm273_vm7 = vcmp.eq.f32.partialorder %v1662_v45, %v246_v35  ;;  %v370_v37 = vshra.s32 %v1722_v34, 16  ;;  %v1754_v55 = vcvt.s32.f32 %v356_v47 }
 0x17e   :  { %v1732_v39 = vsel %vm273_vm7, %v1693_v0, 128  ;;  %v248_v40 = vpop.xlane.xlu1 %247 }
 0x17f   :  { %vm274_vm8 = vcmp.eq.f32.partialorder %v1664_v46, %v248_v40  ;;  %345 = vmin.xlane.f32.xlu1 %v1725_v36  ;;  %v384_v41 = vshra.s32 %v1732_v39, 16  ;;  %v1742_v45 = vcvt.s32.f32 %v370_v37 }
 0x180   :  { %v1738_v42 = vsel %vm274_vm8, %v1693_v0, 128  ;;  %v250_v43 = vpop.xlane.xlu0 %249 }
 0x181   :  { %v1740_v44 = vcvt.s32.f32 %v384_v41  ;;  %v398_v48 = vshra.s32 %v1738_v42, 16  ;;  %vm275_vm9 = vcmp.eq.f32.partialorder %v1667_v49, %v250_v43 }
 0x182   :  { %v252_v50 = vpop.xlane.xlu1 %251  ;;  %v1760_v49 = vsel %vm275_vm9, %v1693_v0, 128 }
 0x183   :  { %vm276_vm10 = vcmp.eq.f32.partialorder %v1670_v52, %v252_v50  ;;  %387 = vmin.xlane.f32.xlu0 %v1740_v44  ;;  %373 = vmin.xlane.f32.xlu1 %v1742_v45  ;;  %v1756_v56 = vcvt.s32.f32 %v398_v48  ;;  %v412_v13 = vshra.s32 %v1760_v49, 16 }
 0x184   :  { %v1751_v46 = vsel %vm276_vm10, %v1693_v0, 128  ;;  %v254_v51 = vpop.xlane.xlu0 %253 }
 0x185   :  { %vm277_vm11 = vcmp.eq.f32.partialorder %v1673_v53, %v254_v51  ;;  %v426_v58 = vshra.s32 %v1751_v46, 16  ;;  %v1786_v32 = vcvt.s32.f32 %v412_v13  ;;  %v327_v51 = vand.u32 65535, %v1696_v3 }
 0x186   :  { %v1763_v52 = vsel %vm277_vm11, %v1693_v0, 128  ;;  %v256_v59 = vpop.xlane.xlu1 %255 }
 0x187   :  { %vm278_vm12 = vcmp.eq.f32.partialorder %v1676_v54, %v256_v59  ;;  %359 = vmin.xlane.f32.xlu0 %v1754_v55  ;;  %401 = vmin.xlane.f32.xlu1 %v1756_v56  ;;  %v440_v53 = vshra.s32 %v1763_v52, 16  ;;  %v1774_v8 = vcvt.s32.f32 %v426_v58  ;;  %v299_v58 = vand.u32 65535, %v1699_v4 }
 0x188   :  { %v1770_v1 = vsel %vm278_vm12, %v1693_v0, 128  ;;  %v258_v2 = vpop.xlane.xlu0 %257 }
 0x189   :  { %v1772_v7 = vcvt.s32.f32 %v440_v53  ;;  %v454_v19 = vshra.s32 %v1770_v1, 16  ;;  %vm279_vm13 = vcmp.eq.f32.partialorder %v1679_v57, %v258_v2  ;;  %v329_v53 = vcvt.s32.f32 %v327_v51 }
 0x18a   :  { %v260_v26 = vpop.xlane.xlu1 %259  ;;  %v1792_v57 = vsel %vm279_vm13, %v1693_v0, 128  ;;  %v313_v2 = vand.u32 65535, %v1709_v25 }
 0x18b   :  { %vm280_vm14 = vcmp.eq.f32.partialorder %v1682_v60, %v260_v26  ;;  %443 = vmin.xlane.f32.xlu0 %v1772_v7  ;;  %429 = vmin.xlane.f32.xlu1 %v1774_v8  ;;  %v1788_v33 = vcvt.s32.f32 %v454_v19  ;;  %v468_v47 = vshra.s32 %v1792_v57, 16  ;;  %v301_v26 = vcvt.s32.f32 %v299_v58 }
 0x18c   :  { %v1783_v54 = vsel %vm280_vm14, %v1693_v0, 128  ;;  %v262_v29 = vpop.xlane.xlu0 %261  ;;  %v315_v3 = vcvt.s32.f32 %v313_v2 }
 0x18d   :  { %vm281_vm15 = vcmp.eq.f32.partialorder %v1685_v61, %v262_v29  ;;  %v482_v35 = vshra.s32 %v1783_v54, 16  ;;  %v341_v29 = vand.u32 65535, %v1706_v20 }
 0x18e   :  { %v1795_v60 = vsel %vm281_vm15, %v1693_v0, 128  ;;  %v264_v37 = vpop.xlane.xlu1 %263 }
 0x18f   :  { %vm282_vm1 = vcmp.eq.f32.partialorder %v1688_v62, %v264_v37  ;;  %415 = vmin.xlane.f32.xlu0 %v1786_v32  ;;  %457 = vmin.xlane.f32.xlu1 %v1788_v33  ;;  %v496_v61 = vshra.s32 %v1795_v60, 16  ;;  %v1806_v43 = vcvt.s32.f32 %v482_v35  ;;  %v1812_v62 = vcvt.s32.f32 %v468_v47 }
 0x190   :  { %v1802_v40 = vsel %vm282_vm1, %v1693_v0, 128  ;;  %v383_v37 = vand.u32 65535, %v1732_v39  ;;  %v343_v20 = vcvt.s32.f32 %v341_v29 }
 0x191   :  { %v1804_v41 = vcvt.s32.f32 %v496_v61  ;;  %v510_v48 = vshra.s32 %v1802_v40, 16 }
 0x192   :  { %v385_v58 = vcvt.s32.f32 %v383_v37 }
 0x193   :  { %499 = vmin.xlane.f32.xlu0 %v1804_v41  ;;  %485 = vmin.xlane.f32.xlu1 %v1806_v43  ;;  %v1814_v50 = vcvt.s32.f32 %v510_v48  ;;  %v397_v48 = vand.u32 65535, %v1738_v42  ;;  %v439_v42 = vand.u32 65535, %v1763_v52  ;;  %v453_v52 = vand.u32 65535, %v1770_v1 }
 0x194   :  { %v495_v1 = vand.u32 65535, %v1795_v60  ;;  %v509_v60 = vand.u32 65535, %v1802_v40 }
 0x197   :  { %471 = vmin.xlane.f32.xlu0 %v1812_v62  ;;  %513 = vmin.xlane.f32.xlu1 %v1814_v50 }
 0x203   :  { %v1820_v59 = vpop.xlane.xlu0 %331 }
 0x204   :  { %vm333_vm2 = vcmp.eq.f32.partialorder %v1702_v14, %v1820_v59  ;;  %v369_v14 = vand.u32 65535, %v1722_v34 }
 0x205   :  { %v334_v13 = vsel %vm333_vm2, %v329_v53, inf }
 0x206   :  { %335 = vmin.xlane.f32.xlu0 %v334_v13  ;;  %v371_v34 = vcvt.s32.f32 %v369_v14  ;;  %v1497_v14 = vmov 0.0  }
 0x207   :  { %v1825_v19 = vpop.xlane.xlu0 %303  ;;  %946 = vst [vmem:[#allocation4] sm:$0x1] %v1497_v14 }
 0x208   :  { %v1828_v35 = vpop.xlane.xlu1 %317  ;;  %vm305_vm3 = vcmp.eq.f32.partialorder %v1713_v30, %v1825_v19  ;;  %v355_v30 = vand.u32 65535, %v1729_v38  ;;  %v425_v38 = vand.u32 65535, %v1751_v46  ;;  %v411_v46 = vand.u32 65535, %v1760_v49 }
 0x209   :  { %v306_v4 = vsel %vm305_vm3, %v301_v26, inf  ;;  %vm319_vm4 = vcmp.eq.f32.partialorder %v1715_v31, %v1828_v35  ;;  %v399_v26 = vcvt.s32.f32 %v397_v48  ;;  %v481_v49 = vand.u32 65535, %v1783_v54 }
 0x20a   :  { %307 = vmin.xlane.f32.xlu0 %v306_v4  ;;  %v320_v25 = vsel %vm319_vm4, %v315_v3, inf  ;;  %v357_v13 = vcvt.s32.f32 %v355_v30  ;;  %v441_v4 = vcvt.s32.f32 %v439_v42  ;;  %v467_v54 = vand.u32 65535, %v1792_v57 }
 0x20b   :  { %321 = vmin.xlane.f32.xlu1 %v320_v25  ;;  %v427_v25 = vcvt.s32.f32 %v425_v38  ;;  %v511_v38 = vcvt.s32.f32 %v509_v60  ;;  %vm741_vm3 = vcmask 130112   ;;  %vm748_vm4 = vcmask 195712  }
 0x20c   :  { %v1836_v61 = vpop.xlane.xlu1 %345  ;;  %v469_v40 = vcvt.s32.f32 %v467_v54 }
 0x20d   :  { %vm347_vm5 = vcmp.eq.f32.partialorder %v1725_v36, %v1836_v61 }
 0x20e   :  { %v348_v47 = vsel %vm347_vm5, %v343_v20, inf  ;;  %vm755_vm5 = vcmask 261312  }
 0x20f   :  { %349 = vmin.xlane.f32.xlu1 %v348_v47  ;;  %v413_v47 = vcvt.s32.f32 %v411_v46 }
 0x210   :  { %v1842_v31 = vpop.xlane.xlu0 %387  ;;  %v1844_v51 = vpop.xlane.xlu1 %373 }
 0x211   :  { %vm389_vm6 = vcmp.eq.f32.partialorder %v1740_v44, %v1842_v31  ;;  %vm375_vm7 = vcmp.eq.f32.partialorder %v1742_v45, %v1844_v51 }
 0x212   :  { %v390_v39 = vsel %vm389_vm6, %v385_v58, inf  ;;  %v376_v36 = vsel %vm375_vm7, %v371_v34, inf  ;;  %v497_v34 = vcvt.s32.f32 %v495_v1 }
 0x213   :  { %391 = vmin.xlane.f32.xlu0 %v390_v39  ;;  %377 = vmin.xlane.f32.xlu1 %v376_v36  ;;  %v483_v39 = vcvt.s32.f32 %v481_v49 }
 0x214   :  { %v1852_v53 = vpop.xlane.xlu0 %359  ;;  %v1854_v2 = vpop.xlane.xlu1 %401 }
 0x215   :  { %vm361_vm8 = vcmp.eq.f32.partialorder %v1754_v55, %v1852_v53  ;;  %vm403_vm9 = vcmp.eq.f32.partialorder %v1756_v56, %v1854_v2 }
 0x216   :  { %v362_v44 = vsel %vm361_vm8, %v357_v13, inf  ;;  %v404_v45 = vsel %vm403_vm9, %v399_v26, inf }
 0x217   :  { %363 = vmin.xlane.f32.xlu0 %v362_v44  ;;  %405 = vmin.xlane.f32.xlu1 %v404_v45  ;;  %v750_v44 = vadd.s32 4294967272, %v1693_v0 }
 0x218   :  { %v1862_v29 = vpop.xlane.xlu0 %443  ;;  %v1864_v3 = vpop.xlane.xlu1 %429 }
 0x219   :  { %vm445_vm10 = vcmp.eq.f32.partialorder %v1772_v7, %v1862_v29  ;;  %vm431_vm11 = vcmp.eq.f32.partialorder %v1774_v8, %v1864_v3  ;;  %v455_v7 = vcvt.s32.f32 %v453_v52 }
 0x21a   :  { %v446_v55 = vsel %vm445_vm10, %v441_v4, inf  ;;  %v432_v56 = vsel %vm431_vm11, %v427_v25, inf  ;;  %vm762_vm10 = vcmask 326912  }
 0x21b   :  { %447 = vmin.xlane.f32.xlu0 %v446_v55  ;;  %433 = vmin.xlane.f32.xlu1 %v432_v56 }
 0x21c   :  { %v1873_v37 = vpop.xlane.xlu0 %415  ;;  %v1875_v20 = vpop.xlane.xlu1 %457 }
 0x21d   :  { %vm417_vm12 = vcmp.eq.f32.partialorder %v1786_v32, %v1873_v37  ;;  %vm459_vm13 = vcmp.eq.f32.partialorder %v1788_v33, %v1875_v20 }
 0x21e   :  { %v418_v8 = vsel %vm417_vm12, %v413_v47, inf  ;;  %v460_v30 = vsel %vm459_vm13, %v455_v7, inf  ;;  %vm769_vm13 = vcmask 392512  }
 0x21f   :  { %419 = vmin.xlane.f32.xlu0 %v418_v8  ;;  %461 = vmin.xlane.f32.xlu1 %v460_v30 }
 0x220   :  { %v1883_v48 = vpop.xlane.xlu0 %499  ;;  %v1885_v58 = vpop.xlane.xlu1 %485 }
 0x221   :  { %vm501_vm14 = vcmp.eq.f32.partialorder %v1804_v41, %v1883_v48  ;;  %vm487_vm15 = vcmp.eq.f32.partialorder %v1806_v43, %v1885_v58  ;;  %v506_v45 = vcvt.f32.s32 %v1883_v48  ;;  %v492_v46 = vcvt.f32.s32 %v1885_v58 }
 0x222   :  { %v502_v32 = vsel %vm501_vm14, %v497_v34, inf  ;;  %v488_v33 = vsel %vm487_vm15, %v483_v39, inf  ;;  %vm776_vm14 = vcmask 458112   ;;  %vm783_vm15 = vcmask 523712  }
 0x223   :  { %503 = vmin.xlane.f32.xlu0 %v502_v32  ;;  %489 = vmin.xlane.f32.xlu1 %v488_v33  ;;  %v1962_v47 = vshll.u32 %v506_v45, 16  ;;  %v1964_v7 = vshll.u32 %v492_v46, 16  ;;  %v1498_v32 = vmov 1.0  }
 0x224   :  { %v1891_v36 = vpop.xlane.xlu0 %471  ;;  %v1893_v57 = vpop.xlane.xlu1 %513 }
 0x225   :  { %vm473_vm1 = vcmp.eq.f32.partialorder %v1812_v62, %v1891_v36  ;;  %vm515_vm2 = vcmp.eq.f32.partialorder %v1814_v50, %v1893_v57  ;;  %v478_v54 = vcvt.f32.s32 %v1891_v36  ;;  %v520_v33 = vcvt.f32.s32 %v1893_v57 }
 0x226   :  { %v474_v41 = vsel %vm473_vm1, %v469_v40, inf  ;;  %v516_v42 = vsel %vm515_vm2, %v511_v38, inf  ;;  %v757_v57 = vadd.s32 4294967264, %v1693_v0  ;;  %vm790_vm2 = vcmask 589312  }
 0x227   :  { %475 = vmin.xlane.f32.xlu0 %v474_v41  ;;  %517 = vmin.xlane.f32.xlu1 %v516_v42 }
 0x254   :  { %975 = vxpose.xlu0.b32.start [1/16] (narrow) %v1555_v5, 32  ;;  %v338_v5 = vcvt.f32.s32 %v1820_v59 }
 0x258   :  { %976 = vxpose.xlu0.b32.cont [2/16] (narrow) %v1560_v6, 32  ;;  %v310_v6 = vcvt.f32.s32 %v1825_v19  ;;  %v422_v19 = vcvt.f32.s32 %v1873_v37 }
 0x25c   :  { %977 = vxpose.xlu0.b32.cont [3/16] (narrow) %v1568_v9, 32  ;;  %v324_v9 = vcvt.f32.s32 %v1828_v35 }
 0x260   :  { %978 = vxpose.xlu0.b32.cont [4/16] (narrow) %v1573_v10, 32  ;;  %v352_v10 = vcvt.f32.s32 %v1836_v61 }
 0x262   :  { %v353_v43 = vshll.u32 %v352_v10, 16 }
 0x264   :  { %979 = vxpose.xlu0.b32.cont [5/16] (narrow) %v1578_v11, 32  ;;  %v1919_v11 = vshrl.u32 %v265_v63, 7  ;;  %v325_v63 = vshll.u32 %v324_v9, 16  ;;  %v1985_v9 = vshll.u32 %v478_v54, 16  ;;  %v2034_v54 = vadd.s32 4294967192, %v1693_v0 }
 0x266   :  { %v753_v37 = vsub.s32 %v750_v44, %v1919_v11  ;;  %v760_v45 = vsub.s32 %v757_v57, %v1919_v11 }
 0x268   :  { %980 = vxpose.xlu0.b32.cont [6/16] (narrow) %v1583_v12, 32  ;;  %v743_v12 = vadd.s32 4294967280, %v1693_v0 }
 0x26a   :  { %v746_v62 = vsub.s32 %v743_v12, %v1919_v11 }
 0x26c   :  { %981 = vxpose.xlu0.b32.cont [7/16] (narrow) %v1594_v15, 32  ;;  %v394_v15 = vcvt.f32.s32 %v1842_v31 }
 0x26e   :  { %v1931_v59 = vshll.u32 %v394_v15, 16 }
 0x270   :  { %982 = vxpose.xlu0.b32.cont [8/16] (narrow) %v1599_v16, 32  ;;  %v380_v16 = vcvt.f32.s32 %v1844_v51  ;;  %v464_v51 = vcvt.f32.s32 %v1875_v20  ;;  %v1960_v20 = vadd.s32 4294967256, %v1693_v0 }
 0x272   :  { %v1956_v56 = vshll.u32 %v464_v51, 16  ;;  %v767_v38 = vsub.s32 %v1960_v20, %v1919_v11 }
 0x274   :  { %983 = vxpose.xlu0.b32.cont [9/16] (narrow) %v1604_v17, 32  ;;  %v366_v17 = vcvt.f32.s32 %v1852_v53  ;;  %v734_v53 = vsub.s32 %v1693_v0, %v1919_v11 }
 0x276   :  { %v1936_v61 = vshll.u32 %v366_v17, 16 }
 0x278   :  { %984 = vxpose.xlu0.b32.cont [10/16] (narrow) %v1609_v18, 32  ;;  %v408_v18 = vcvt.f32.s32 %v1854_v2 }
 0x27a   :  { %v1938_v31 = vshll.u32 %v408_v18, 16 }
 0x27c   :  { %985 = vxpose.xlu0.b32.cont [11/16] (narrow) %v1620_v21, 32  ;;  %v339_v21 = vshll.u32 %v338_v5, 16 }
 0x280   :  { %986 = vxpose.xlu0.b32.cont [12/16] (narrow) %v1625_v22, 32  ;;  %v450_v22 = vcvt.f32.s32 %v1862_v29  ;;  %v1952_v29 = vadd.s32 4294967248, %v1693_v0 }
 0x282   :  { %v1943_v2 = vshll.u32 %v450_v22, 16  ;;  %v774_v30 = vsub.s32 %v1952_v29, %v1919_v11 }
 0x284   :  { %987 = vxpose.xlu0.b32.cont [13/16] (narrow) %v1630_v23, 32  ;;  %v436_v23 = vcvt.f32.s32 %v1864_v3  ;;  %v1954_v3 = vshll.u32 %v422_v19, 16 }
 0x286   :  { %v1945_v13 = vshll.u32 %v436_v23, 16  ;;  %v778_v23 = vadd.s32 4294967240, %v1693_v0 }
 0x288   :  { %988 = vxpose.xlu0.b32.cont [14/16] (narrow) %v1635_v24, 32  ;;  %v736_v24 = vadd.s32 4294967288, %v1693_v0 }
 0x28a   :  { %v739_v26 = vsub.s32 %v736_v24, %v1919_v11  ;;  %v1995_v24 = vadd.s32 4294967216, %v1693_v0 }
 0x28c   :  { %989 = vxpose.xlu0.b32.cont [15/16] (narrow) %v1646_v27, 32  ;;  %v311_v27 = vshll.u32 %v310_v6, 16  ;;  %v1499_v6 = vmov 1.0|1.0  }
 0x290   :  { %990 = vxpose.xlu0.b32.end [16/16] (narrow) %v1651_v28, 32  ;;  %v1933_v28 = vshll.u32 %v380_v16, 16 }
 0x293   :  { %v336_v50 = vpop.xlane.xlu0 %335 }
 0x294   :  { %v337_v35 = vcvt.f32.s32 %v336_v50  ;;  %v2008_v50 = vadd.s32 4294967232, %v1693_v0 }
 0x296   :  { %v340_v4 = vadd.s32 %v339_v21, %v337_v35 }
 0x297   :  { %v308_v52 = vpop.xlane.xlu0 %307 }
 0x298   :  { %v309_v25 = vcvt.f32.s32 %v308_v52  ;;  %v322_v55 = vpop.xlane.xlu1 %321  ;;  %vm525_vm7 = vcmp.eq.s32.totalorder %v1693_v0, %v340_v4  ;;  %v747_v40 = vrot.slane %v340_v4, %v746_v62  ;;  %v802_v4 = vsub.s32 %v1995_v24, %v1919_v11 }
 0x299   :  { %v323_v49 = vcvt.f32.s32 %v322_v55  ;;  %v1193_v12 = vsel %vm525_vm7, 1.0, %v1497_v14 }
 0x29a   :  { %v312_v1 = vadd.s32 %v311_v27, %v309_v25  ;;  %v1998_v27 = vadd.s32 4294967224, %v1693_v0 }
 0x29b   :  { %v326_v8 = vadd.s32 %v325_v63, %v323_v49  ;;  %v2000_v63 = vshll.u32 %v520_v33, 16  ;;  %v788_v49 = vsub.s32 %v2008_v50, %v1919_v11  ;;  %v834_v50 = vadd.s32 4294967176, %v1693_v0 }
 0x29c   :  { %v735_v60 = vrot.slane %v312_v1, %v734_v53  ;;  %v350_v48 = vpop.xlane.xlu1 %349  ;;  %vm523_vm6 = vcmp.eq.s32.totalorder %v1693_v0, %v312_v1  ;;  %v795_v25 = vsub.s32 %v1998_v27, %v1919_v11 }
 0x29d   :  { %v740_v58 = vrot.slane %v326_v8, %v739_v26  ;;  %v351_v34 = vcvt.f32.s32 %v350_v48  ;;  %v1191_v39 = vsel %vm523_vm6, 1.0, %v1497_v14  ;;  %1317 = vmatprep.mubr.msk.f32.mxu1 %vm523_vm6, %v1498_v32  ;;  %vm524_vm8 = vcmp.eq.s32.totalorder %v1693_v0, %v326_v8 }
 0x29e   :  { %v1192_v36 = vsel %vm524_vm8, 1.0, %v1497_v14  ;;  %1318 = vmatmul.mubr.msk.f32.vlgmr.msra.gmra.mrb[0].mxu1 %vm524_vm8, %v1498_v32  ;;  %vm1387_vm9 = vmpackc.low %vm524_vm8, %vm523_vm6  ;;  %v2013_v26 = vadd.s32 4294967208, %v1693_v0  ;;  %v2031_v8 = vadd.s32 4294967184, %v1693_v0 }
 0x29f   :  { %v742_v41 = vsel %vm741_vm3, %v740_v58, %v735_v60  ;;  %v354_v42 = vadd.s32 %v353_v43, %v351_v34  ;;  %v952_v5 = vadd.f32 %v1192_v36, %v1191_v39  ;;  %1320 = vmatprep.mubr.msk.f32.mxu1 %vm525_vm7, %v1498_v32  ;;  %1388 = vmatprep.subr.msk.bf16.mxu0 %vm1387_vm9, %v1499_v6  ;;  %v2048_v34 = vadd.s32 4294967200, %v1693_v0 }
 0x2a0   :  { %v749_v10 = vsel %vm748_vm4, %v747_v40, %v742_v41  ;;  %v392_v15 = vpop.xlane.xlu0 %391  ;;  %1390 = vmatpush3.bf16.msk.msra.mxu0 %vm1387_vm9, %v1499_v6  ;;  %v378_v16 = vpop.xlane.xlu1 %377  ;;  %v809_v20 = vsub.s32 %v2013_v26, %v1919_v11  ;;  %vm797_vm4 = vcmask 654912   ;;  %vm804_vm9 = vcmask 720512  }
 0x2a1   :  { %v754_v17 = vrot.slane %v354_v42, %v753_v37  ;;  %v953_v18 = vadd.f32 %v1193_v12, %v952_v5  ;;  %v393_v21 = vcvt.f32.s32 %v392_v15  ;;  %v379_v22 = vcvt.f32.s32 %v378_v16 }
 0x2a2   :  { %vm526_vm11 = vcmp.eq.s32.totalorder %v1693_v0, %v354_v42 }
 0x2a3   :  { %v756_v43 = vsel %vm755_vm5, %v754_v17, %v749_v10  ;;  %v1194_v62 = vsel %vm526_vm11, 1.0, %v1497_v14  ;;  %1321 = vmatmul.mubr.msk.f32.gmra.mrb[2].mxu1 %vm526_vm11, %v1498_v32  ;;  %vm1391_vm12 = vmpackc.low %vm526_vm11, %vm525_vm7  ;;  %v382_v19 = vadd.s32 %v1933_v28, %v379_v22  ;;  %v396_v44 = vadd.s32 %v1931_v59, %v393_v21 }
 0x2a4   :  { %v954_v35 = vadd.f32 %v1194_v62, %v953_v18  ;;  %1392 = vmatprep.subr.msk.bf16.mxu0 %vm1391_vm12, %v1499_v6  ;;  %v364_v51 = vpop.xlane.xlu0 %363  ;;  %v406_v53 = vpop.xlane.xlu1 %405  ;;  %v781_v28 = vsub.s32 %v778_v23, %v1919_v11  ;;  %v830_v17 = vsub.s32 %v2031_v8, %v1919_v11 }
 0x2a5   :  { %v365_v46 = vcvt.f32.s32 %v364_v51  ;;  %1394 = vmatpush3.bf16.msk.msra.mxu0 %vm1391_vm12, %v1499_v6  ;;  %v407_v52 = vcvt.f32.s32 %v406_v53  ;;  %vm528_vm1 = vcmp.eq.s32.totalorder %v1693_v0, %v382_v19  ;;  %vm529_vm5 = vcmp.eq.s32.totalorder %v1693_v0, %v396_v44 }
 0x2a6   :  { %v768_v60 = vrot.slane %v382_v19, %v767_v38  ;;  %v775_v39 = vrot.slane %v396_v44, %v774_v30  ;;  %v1196_v29 = vsel %vm528_vm1, 1.0, %v1497_v14  ;;  %v1197_v18 = vsel %vm529_vm5, 1.0, %v1497_v14 }
 0x2a7   :  { %v368_v55 = vadd.s32 %v1936_v61, %v365_v46  ;;  %v410_v59 = vadd.s32 %v1938_v31, %v407_v52 }
 0x2a8   :  { %v448_v1 = vpop.xlane.xlu0 %447  ;;  %v434_v37 = vpop.xlane.xlu1 %433 }
 0x2a9   :  { %v761_v61 = vrot.slane %v368_v55, %v760_v45  ;;  %vm530_vm3 = vcmp.eq.s32.totalorder %v1693_v0, %v410_v59  ;;  %v449_v31 = vcvt.f32.s32 %v448_v1  ;;  %v435_v48 = vcvt.f32.s32 %v434_v37 }
 0x2aa   :  { %vm527_vm6 = vcmp.eq.s32.totalorder %v1693_v0, %v368_v55  ;;  %vm2043_vm7 = vmpackc.low %vm530_vm3, %vm529_vm5  ;;  %v782_v40 = vrot.slane %v410_v59, %v781_v28  ;;  %v1198_v22 = vsel %vm530_vm3, 1.0, %v1497_v14 }
 0x2ab   :  { %v763_v33 = vsel %vm762_vm10, %v761_v61, %v756_v43  ;;  %v1195_v36 = vsel %vm527_vm6, 1.0, %v1497_v14  ;;  %1323 = vmatprep.mubr.msk.f32.mxu1 %vm527_vm6, %v1498_v32  ;;  %vm1395_vm8 = vmpackc.low %vm528_vm1, %vm527_vm6  ;;  %v2060_v41 = vadd.s32 %v1943_v2, %v449_v31  ;;  %v438_v10 = vadd.s32 %v1945_v13, %v435_v48 }
 0x2ac   :  { %v770_v38 = vsel %vm769_vm13, %v768_v60, %v763_v33  ;;  %v955_v42 = vadd.f32 %v1195_v36, %v954_v35  ;;  %1324 = vmatmul.mubr.msk.f32.gmra.mrb[4].mxu1 %vm528_vm1, %v1498_v32  ;;  %1396 = vmatprep.subr.msk.bf16.mxu0 %vm1395_vm8, %v1499_v6  ;;  %v420_v30 = vpop.xlane.xlu0 %419  ;;  %v462_v5 = vpop.xlane.xlu1 %461  ;;  %vm811_vm10 = vcmask 786112   ;;  %v837_v31 = vsub.s32 %v834_v50, %v1919_v11 }
 0x2ad   :  { %v777_v57 = vsel %vm776_vm14, %v775_v39, %v770_v38  ;;  %v421_v12 = vcvt.f32.s32 %v420_v30  ;;  %1326 = vmatprep.mubr.msk.f32.mxu1 %vm529_vm5, %v1498_v32  ;;  %1398 = vmatpush3.bf16.msk.msra.mxu0 %vm1395_vm8, %v1499_v6  ;;  %v463_v2 = vcvt.f32.s32 %v462_v5  ;;  %vm532_vm12 = vcmp.eq.s32.totalorder %v1693_v0, %v438_v10 }
 0x2ae   :  { %v784_v15 = vsel %vm783_vm15, %v782_v40, %v777_v57  ;;  %v956_v16 = vadd.f32 %v1196_v29, %v955_v42  ;;  %1400 = vmatprep.subr.msk.bf16.mxu0 %vm2043_vm7, %v1499_v6  ;;  %vm533_vm13 = vcmp.eq.s32.totalorder %v1693_v0, %v2060_v41  ;;  %v803_v44 = vrot.slane %v2060_v41, %v802_v4 }
 0x2af   :  { %v424_v13 = vadd.s32 %v1954_v3, %v421_v12  ;;  %v466_v21 = vadd.s32 %v1956_v56, %v463_v2  ;;  %v816_v3 = vsub.s32 %v2048_v34, %v1919_v11  ;;  %v796_v56 = vrot.slane %v438_v10, %v795_v25 }
 0x2b0   :  { %v957_v23 = vadd.f32 %v1197_v18, %v956_v16  ;;  %1327 = vmatmul.mubr.msk.f32.gmra.mrb[6].mxu1 %vm530_vm3, %v1498_v32  ;;  %v504_v43 = vpop.xlane.xlu0 %503  ;;  %v490_v62 = vpop.xlane.xlu1 %489  ;;  %v1200_v24 = vsel %vm532_vm12, 1.0, %v1497_v14  ;;  %v1201_v48 = vsel %vm533_vm13, 1.0, %v1497_v14  ;;  %vm825_vm3 = vcmask 917312  }
 0x2b1   :  { %v789_v19 = vrot.slane %v424_v13, %v788_v49  ;;  %vm534_vm11 = vcmp.eq.s32.totalorder %v1693_v0, %v466_v21  ;;  %1402 = vmatpush3.bf16.msk.msra.mxu0 %vm2043_vm7, %v1499_v6  ;;  %v491_v35 = vcvt.f32.s32 %v490_v62  ;;  %vm531_vm14 = vcmp.eq.s32.totalorder %v1693_v0, %v424_v13  ;;  %v951_v13 = vld [vmem:[#allocation4] sm:$0x1] }
 0x2b2   :  { %v958_v51 = vadd.f32 %v1198_v22, %v957_v23  ;;  %vm2111_vm15 = vmpackc.low %vm534_vm11, %vm533_vm13  ;;  %v505_v45 = vcvt.f32.s32 %v504_v43  ;;  %v1199_v46 = vsel %vm531_vm14, 1.0, %v1497_v14  ;;  %1329 = vmatprep.mubr.msk.f32.mxu1 %vm531_vm14, %v1498_v32  ;;  %v810_v28 = vrot.slane %v466_v21, %v809_v20 }
 0x2b3   :  { %v791_v27 = vsel %vm790_vm2, %v789_v19, %v784_v15  ;;  %vm1403_vm1 = vmpackc.low %vm532_vm12, %vm531_vm14  ;;  %v494_v49 = vadd.s32 %v1964_v7, %v491_v35  ;;  %v823_v20 = vsub.s32 %v2034_v54, %v1919_v11  ;;  %vm818_vm2 = vcmask 851712  }
 0x2b4   :  { %v798_v52 = vsel %vm797_vm4, %v796_v56, %v791_v27  ;;  %v959_v25 = vadd.f32 %v1199_v46, %v958_v51  ;;  %1330 = vmatmul.mubr.msk.f32.gmra.mrb[8].mxu1 %vm532_vm12, %v1498_v32  ;;  %1404 = vmatprep.subr.msk.bf16.mxu0 %vm1403_vm1, %v1499_v6  ;;  %v476_v4 = vpop.xlane.xlu0 %475  ;;  %v518_v55 = vpop.xlane.xlu1 %517  ;;  %v508_v7 = vadd.s32 %v1962_v47, %v505_v45  ;;  %vm832_vm4 = vcmask 982912  }
 0x2b5   :  { %v805_v59 = vsel %vm804_vm9, %v803_v44, %v798_v52  ;;  %v477_v1 = vcvt.f32.s32 %v476_v4  ;;  %1332 = vmatprep.mubr.msk.f32.mxu1 %vm533_vm13, %v1498_v32  ;;  %1406 = vmatpush3.bf16.msk.msra.mxu0 %vm1403_vm1, %v1499_v6  ;;  %v519_v26 = vcvt.f32.s32 %v518_v55  ;;  %v1202_v47 = vsel %vm534_vm11, 1.0, %v1497_v14 }
 0x2b6   :  { %v812_v37 = vsel %vm811_vm10, %v810_v28, %v805_v59  ;;  %v960_v61 = vadd.f32 %v1200_v24, %v959_v25  ;;  %1408 = vmatprep.subr.msk.bf16.mxu0 %vm2111_vm15, %v1499_v6  ;;  %vm536_vm6 = vcmp.eq.s32.totalorder %v1693_v0, %v494_v49  ;;  %v831_v33 = vrot.slane %v508_v7, %v830_v17 }
 0x2b7   :  { %v480_v60 = vadd.s32 %v1985_v9, %v477_v1  ;;  %v522_v58 = vadd.s32 %v2000_v63, %v519_v26  ;;  %v824_v63 = vrot.slane %v494_v49, %v823_v20  ;;  %vm839_vm9 = vcmask 1048512  }
 0x2b8   :  { %v961_v34 = vadd.f32 %v1201_v48, %v960_v61  ;;  %1333 = vmatmul.mubr.msk.f32.gmra.mrb[10].mxu1 %vm534_vm11, %v1498_v32  ;;  %vm537_vm10 = vcmp.eq.s32.totalorder %v1693_v0, %v508_v7  ;;  %v1204_v11 = vsel %vm536_vm6, 1.0, %v1497_v14 }
 0x2b9   :  { %v817_v9 = vrot.slane %v480_v60, %v816_v3  ;;  %1410 = vmatpush3.bf16.msk.msra.mxu0 %vm2111_vm15, %v1499_v6  ;;  %vm535_vm5 = vcmp.eq.s32.totalorder %v1693_v0, %v480_v60  ;;  %vm538_vm7 = vcmp.eq.s32.totalorder %v1693_v0, %v522_v58  ;;  %v838_v36 = vrot.slane %v522_v58, %v837_v31 }
 0x2ba   :  { %v1203_v54 = vsel %vm535_vm5, 1.0, %v1497_v14  ;;  %1335 = vmatprep.mubr.msk.f32.mxu1 %vm535_vm5, %v1498_v32  ;;  %v962_v39 = vadd.f32 %v1202_v47, %v961_v34  ;;  %vm1411_vm8 = vmpackc.low %vm536_vm6, %vm535_vm5  ;;  %v1205_v30 = vsel %vm537_vm10, 1.0, %v1497_v14  ;;  %v1206_v57 = vsel %vm538_vm7, 1.0, %v1497_v14 }
 0x2bb   :  { %1412 = vmatprep.subr.msk.bf16.mxu0 %vm1411_vm8, %v1499_v6  ;;  %v819_v40 = vsel %vm818_vm2, %v817_v9, %v812_v37  ;;  %vm1415_vm11 = vmpackc.low %vm538_vm7, %vm537_vm10 }
 0x2bc   :  { %v963_v38 = vadd.f32 %v1203_v54, %v962_v39  ;;  %1336 = vmatmul.mubr.msk.f32.gmra.mrb[12].mxu1 %vm536_vm6, %v1498_v32  ;;  %v826_v41 = vsel %vm825_vm3, %v824_v63, %v819_v40 }
 0x2bd   :  { %1338 = vmatprep.mubr.msk.f32.mxu1 %vm537_vm10, %v1498_v32  ;;  %1414 = vmatpush3.bf16.msk.msra.mxu0 %vm1411_vm8, %v1499_v6  ;;  %v833_v8 = vsel %vm832_vm4, %v831_v33, %v826_v41 }
 0x2be   :  { %v964_v42 = vadd.f32 %v1204_v11, %v963_v38  ;;  %1416 = vmatprep.subr.msk.bf16.mxu0 %vm1415_vm11, %v1499_v6  ;;  %v840_v29 = vsel %vm839_vm9, %v838_v36, %v833_v8 }
 0x2bf   :  { %841 = vst [vmem:[#allocation2] sm:$0x1] %v840_v29 }
 0x2c0   :  { %v965_v5 = vadd.f32 %v1205_v30, %v964_v42  ;;  %1339 = vmatmul.mubr.msk.f32.gmra.mrb[14].mxu1 %vm538_vm7, %v1498_v32 }
 0x2c1   :  { %1418 = vmatpush3.bf16.msk.msra.mxu0 %vm1415_vm11, %v1499_v6 }
 0x2c2   :  { %v966_v10 = vadd.f32 %v1206_v57, %v965_v5 }
 0x2c4   :  { %v967_v12 = vrot.slane %v966_v10, 4 }
 0x2c6   :  { %v968_v2 = vadd.f32 %v967_v12, %v966_v10 }
 0x2c8   :  { %v969_v15 = vrot.slane %v968_v2, 2 }
 0x2ca   :  { %v970_v16 = vadd.f32 %v969_v15, %v968_v2 }
 0x2cc   :  { %v971_v17 = vrot.slane %v970_v16, 1 }
 0x2ce   :  { %v972_v18 = vadd.f32 %v971_v17, %v970_v16 }
 0x2d0   :  { %v973_v21 = vadd.f32 %v972_v18, %v951_v13 }
 0x2d2   :  { %974 = vst [vmem:[#allocation4] sm:$0x1] %v973_v21 }
 0x2d4   :  { %v991_v22 = vpop.trf.xlu0 }
 0x2d5   :  { %1373 = vmatprep.mubr.f32.mxu0 %v991_v22 }
 0x2d8   :  { %v992_v23 = vpop.trf.xlu0 }
 0x2d9   :  { %1374 = vmatmul.mubr.f32.vlgmr.msra.gmra.mrb[16].mxu0 %v992_v23 }
 0x2dc   :  { %v993_v32 = vpop.trf.xlu0 }
 0x2dd   :  { %1376 = vmatprep.mubr.f32.mxu0 %v993_v32 }
 0x2e0   :  { %v994_v0 = vpop.trf.xlu0 }
 0x2e1   :  { %1377 = vmatmul.mubr.f32.gmra.mrb[18].mxu0 %v994_v0 }
 0x2e2   :  { %1438 = shalt.err (!%p1435_p4)
}
 0x2e3   :  { %s1439_s19 = scalar_lea.hbm %s2304_s5, 16 }
 0x2e4   :  { %p1440_p5 = scmp.ne.s32.totalorder %s2304_s5, %s1439_s19  ;;  %p1443_p6 = scmp.lt.u32.totalorder %s1439_s19, %s2304_s5 }
 0x2e6   :  { %p1445_p7 = pnand %p1443_p6, %p1440_p5 }
 0x2e8   :  { %1448 = shalt.err (!%p1445_p7)
}
 0x2e9   :  { %1136 = dma.vmem_to_hbm [thread:$0]  %s1134_s2, 16, %s2304_s5, [#allocation5]  }
 0x2ea   :  { %s1449_s26 = scalar_lea.vmem %s1124_s14, 16  ;;  %s1453_s27 = scalar_lea.vmem %s1124_s14, 32 }
 0x2eb   :  { %p1450_p8 = scmp.ne.s32.totalorder %s1124_s14, %s1449_s26  ;;  %p1454_p9 = scmp.lt.s32.totalorder %s1124_s14, %s1124_s14 }
 0x2ec   :  { %p1455_p10 = scmp.lt.s32.totalorder %s1453_s27, %s1449_s26 }
 0x2ee   :  { %p1456_p11 = por %p1455_p10, %p1454_p9 }
 0x2f0   :  { %p1457_p12 = pnand %p1456_p11, %p1450_p8 }
 0x2f2   :  { %1460 = shalt.err (!%p1457_p12)
}
 0x2f3   :  { %s1461_s30 = scalar_lea.hbm %s2303_s4, 16 }
 0x2f4   :  { %p1462_p13 = scmp.ne.s32.totalorder %s2303_s4, %s1461_s30  ;;  %p1465_p0 = scmp.lt.u32.totalorder %s1461_s30, %s2303_s4 }
 0x2f6   :  { %p1467_p1 = pnand %p1465_p0, %p1462_p13 }
 0x2f8   :  { %1470 = shalt.err (!%p1467_p1)
}
 0x2f9   :  { %1126 = dma.vmem_to_hbm [thread:$0]  %s1124_s14, 16, %s2303_s4, [#allocation3]  }
 0x2fa   :  { %s1502_s2 = smov [#allocation6]  }
 0x2fb   :  { %s1142_s13 = sshll.u32 %s1502_s2, 4  ;;  %s1143_s13 = int_to_ptr.vmem [resolvable:$true] %s1142_s13 }
 0x2fc   :  { %s1471_s15 = scalar_lea.vmem %s1143_s13, 512  ;;  %p1476_p3 = scmp.lt.s32.totalorder %s1143_s13, %s1143_s13 }
 0x2fd   :  { %p1472_p2 = scmp.ne.s32.totalorder %s1143_s13, %s1471_s15  ;;  %p1477_p4 = scmp.lt.s32.totalorder %s1471_s15, %s1471_s15 }
 0x2ff   :  { %p1478_p5 = por %p1477_p4, %p1476_p3 }
 0x301   :  { %p1479_p6 = pnand %p1478_p5, %p1472_p2 }
 0x371   :  { %v1319_v14 = vpop.f32.mrb[0].mxu1 }
 0x372   :  { %717 = vst.msk [vmem:[%s2302_s3 + $0x8] sm:$0xff] %vm88_vm0, %v1319_v14  ;;  %v637_v6 = vpop.f32.mrb[1].mxu1 }
 0x373   :  { %716 = vst.msk [vmem:[%s2302_s3] sm:$0xff] %vm88_vm0, %v637_v6 }
 0x376   :  { %v1322_v43 = vpop.f32.mrb[2].mxu1 }
 0x377   :  { %719 = vst.msk [vmem:[%s2302_s3 + $0x18] sm:$0xff] %vm88_vm0, %v1322_v43  ;;  %v647_v62 = vpop.f32.mrb[3].mxu1 }
 0x378   :  { %718 = vst.msk [vmem:[%s2302_s3 + $0x10] sm:$0xff] %vm88_vm0, %v647_v62 }
 0x37f   :  { %v1325_v3 = vpop.f32.mrb[4].mxu1 }
 0x380   :  { %721 = vst.msk [vmem:[%s2302_s3 + $0x28] sm:$0xff] %vm88_vm0, %v1325_v3  ;;  %v657_v50 = vpop.f32.mrb[5].mxu1 }
 0x381   :  { %720 = vst.msk [vmem:[%s2302_s3 + $0x20] sm:$0xff] %vm88_vm0, %v657_v50 }
 0x383   :  { %v1328_v19 = vpop.f32.mrb[6].mxu1 }
 0x384   :  { %723 = vst.msk [vmem:[%s2302_s3 + $0x38] sm:$0xff] %vm88_vm0, %v1328_v19  ;;  %v667_v56 = vpop.f32.mrb[7].mxu1 }
 0x385   :  { %722 = vst.msk [vmem:[%s2302_s3 + $0x30] sm:$0xff] %vm88_vm0, %v667_v56 }
 0x387   :  { %v1331_v35 = vpop.f32.mrb[8].mxu1 }
 0x388   :  { %725 = vst.msk [vmem:[%s2302_s3 + $0x48] sm:$0xff] %vm88_vm0, %v1331_v35  ;;  %v677_v51 = vpop.f32.mrb[9].mxu1 }
 0x389   :  { %724 = vst.msk [vmem:[%s2302_s3 + $0x40] sm:$0xff] %vm88_vm0, %v677_v51 }
 0x38b   :  { %v1334_v53 = vpop.f32.mrb[10].mxu1 }
 0x38c   :  { %727 = vst.msk [vmem:[%s2302_s3 + $0x58] sm:$0xff] %vm88_vm0, %v1334_v53  ;;  %v687_v44 = vpop.f32.mrb[11].mxu1 }
 0x38d   :  { %726 = vst.msk [vmem:[%s2302_s3 + $0x50] sm:$0xff] %vm88_vm0, %v687_v44 }
 0x38f   :  { %v1337_v27 = vpop.f32.mrb[12].mxu1 }
 0x390   :  { %729 = vst.msk [vmem:[%s2302_s3 + $0x68] sm:$0xff] %vm88_vm0, %v1337_v27  ;;  %v697_v45 = vpop.f32.mrb[13].mxu1 }
 0x391   :  { %728 = vst.msk [vmem:[%s2302_s3 + $0x60] sm:$0xff] %vm88_vm0, %v697_v45 }
 0x393   :  { %v1340_v46 = vpop.f32.mrb[14].mxu1 }
 0x394   :  { %731 = vst.msk [vmem:[%s2302_s3 + $0x78] sm:$0xff] %vm88_vm0, %v1340_v46  ;;  %v707_v52 = vpop.f32.mrb[15].mxu1 }
 0x395   :  { %730 = vst.msk [vmem:[%s2302_s3 + $0x70] sm:$0xff] %vm88_vm0, %v707_v52 }
 0x3ac   :  { %v1375_v28 = vpop.f32.mrb[16].mxu0 }
 0x3ad   :  { %v1073_v25 = vpop.f32.mrb[17].mxu0  ;;  %1101 = vst [vmem:[#allocation6 + $0x8] sm:$0xff] %v1375_v28 }
 0x3ae   :  { %1100 = vst [vmem:[#allocation6] sm:$0xff] %v1073_v25 }
 0x3b4   :  { %v1378_v24 = vpop.f32.mrb[18].mxu0 }
 0x3b5   :  { %v1083_v4 = vpop.f32.mrb[19].mxu0  ;;  %1103 = vst [vmem:[#allocation6 + $0x18] sm:$0xff] %v1378_v24 }
 0x3b6   :  { %1102 = vst [vmem:[#allocation6 + $0x10] sm:$0xff] %v1083_v4 }
 0x3b7   :  { %1482 = shalt.err (!%p1479_p6)
}
 0x3b8   :  { %s1483_s14 = scalar_lea.hbm %s2305_s6, 512 }
 0x3b9   :  { %p1484_p7 = scmp.ne.s32.totalorder %s2305_s6, %s1483_s14  ;;  %p1487_p8 = scmp.lt.u32.totalorder %s1483_s14, %s2305_s6 }
 0x3bb   :  { %p1489_p9 = pnand %p1487_p8, %p1484_p7 }
 0x3bd   :  { %1492 = shalt.err (!%p1489_p9)
}
 0x3be   :  { %s1503_s20 = smov 128   ;;  %s1504_s21 = smov 8  }
 0x3bf   :  { %1148 = dma.vmem_to_hbm [thread:$0]  %s1143_s13, 512, %s2305_s6, [#allocation5], %s1503_s20, %s1503_s20, %s1504_s21  }
 0x3c0   :  { %1493 = dma.done.wait [#allocation3], 16  }
 0x3c1   :  { %1494 = vsyncadd [#allocation3], 4294967280 }
 0x3c2   :  { %1495 = dma.done.wait [#allocation5], 528  }
 0x3c3   :  { %1496 = vsyncadd [#allocation5], 4294966768 }
 0x3c4   :  { %1166 = vsyncpa [#allocation3], 1 }
 0x3c5   :  { %1167 = vsyncpa [#allocation5], 1 }

</bundles_post_ra>
